<compile_context>
chip_gen: v7x
topology: tpu7x:2x2x1
jax: 0.10.0
libtpu: 0.0.40
codegen_flags: <defaults>
</compile_context>

<pallas_src>
import functools

import numpy as np
import jax
import jax.numpy as jnp
from jax.experimental import pallas as pl
from jax.experimental.pallas import tpu as pltpu


_LANE = 128
_SUBLANE = 8
# Cap one output block at ~4 MiB so 2x double-buffering stays well inside the
# 32 MiB scoped-VMEM default (and v7x's 64 MiB physical VMEM).
_MAX_BLOCK_BYTES = 4 * 1024 * 1024
# Below this many output elements, plain jnp (XLA-fused iota compare) wins over
# pallas_call launch overhead.
_PALLAS_MIN_ELEMS = 1 << 14


def _round_up(x, mult):
    return ((x + mult - 1) // mult) * mult


def _make_pad_mask_kernel(flip: bool):
    def kernel(len_ref, out_ref):
        lens = len_ref[...]                                           # (tile_n, 1) int32
        col = jax.lax.broadcasted_iota(jnp.int32, out_ref.shape, 1)   # (tile_n, m_pad)
        if flip:
            # mask_pad = 1 - tri  ->  mask[b, j] = (j > L-1) = (j >= L)
            mask = col >= lens
        else:
            # mask_pad = tri      ->  mask[b, j] = (j <= L-1) = (j < L)
            mask = col < lens
        out_ref[...] = mask.astype(out_ref.dtype)
    return kernel


@functools.lru_cache(maxsize=None)
def _build_pallas_mask(n_pad: int, m_pad: int, tile_n: int, flip: bool):
    grid = (n_pad // tile_n,)
    return pl.pallas_call(
        _make_pad_mask_kernel(flip),
        out_shape=jax.ShapeDtypeStruct((n_pad, m_pad), jnp.float32),
        grid=grid,
        in_specs=[pl.BlockSpec((tile_n, 1), lambda i: (i, 0))],
        out_specs=pl.BlockSpec((tile_n, m_pad), lambda i: (i, 0)),
        compiler_params=pltpu.CompilerParams(
            dimension_semantics=("parallel",)),
        cost_estimate=pl.CostEstimate(
            flops=n_pad * m_pad,
            transcendentals=0,
            bytes_accessed=n_pad * m_pad * 4 + n_pad * 4,
        ),
    )


class MakePadMask:
    def __init__(self, max_seq_len=512, flip=True):
        self.max_seq_len = max_seq_len
        self.flip = flip
        # Deterministic "parameter" mirroring the PyTorch buffer; used only for
        # the numpy reference check (the kernel computes it on the fly).
        if flip:
            self.mask_pad = (1 - np.tri(max_seq_len)).astype(bool)
        else:
            self.mask_pad = np.tri(max_seq_len).astype(bool)

    def _mask_2d(self, lengths_flat, m):
        n = int(lengths_flat.shape[0])
        lens = lengths_flat.astype(jnp.int32)

        if n * m < _PALLAS_MIN_ELEMS:
            # Tiny problem: XLA fuses an iota-compare for free; skip the kernel.
            col = jax.lax.broadcasted_iota(jnp.int32, (n, m), 1)
            lens2d = lens.reshape(n, 1)
            mask = (col >= lens2d) if self.flip else (col < lens2d)
            return mask.astype(jnp.float32)

        # Pallas path: 128-aligned lane dim, row tiles sized for VMEM.
        m_pad = _round_up(m, _LANE)
        tile_n = min(512, _MAX_BLOCK_BYTES // (m_pad * 4))
        tile_n = max(_SUBLANE, (tile_n // _SUBLANE) * _SUBLANE)
        n_pad = _round_up(n, tile_n)

        lens2d = jnp.pad(lens.reshape(n, 1), ((0, n_pad - n), (0, 0)))
        fn = _build_pallas_mask(n_pad, m_pad, tile_n, self.flip)
        out = fn(lens2d)
        return out[:n, :m]

    def __call__(self, lengths, xs=None, length_dim=-1, maxlen=None):
        if length_dim == 0:
            raise ValueError("length_dim cannot be 0: {}".format(length_dim))
        lengths = jnp.asarray(lengths)
        if xs is not None and xs.ndim == 3:
            t = xs.shape[2] if length_dim == 1 else xs.shape[1]
            lengths = jnp.broadcast_to(lengths[:, None], (xs.shape[0], t))
        if maxlen is not None:
            m = int(maxlen)
        elif xs is not None:
            m = int(xs.shape[-1])
        else:
            # TODO(synk): device->host sync + per-m recompile; pass maxlen/xs in
            # hot paths to avoid this (kept for parity with torch.max(lengths)).
            m = int(jnp.max(lengths))
        lead = lengths.shape
        flat = lengths.reshape(-1)
        mask = self._mask_2d(flat, m).reshape(*lead, m)
        if length_dim == 1:
            mask = jnp.swapaxes(mask, 1, 2)
        return mask


def _ref_forward(mod, lengths, xs=None, length_dim=-1, maxlen=None):
    """Pure-numpy reference mirroring the PyTorch forward via the mask_pad buffer."""
    lengths = np.asarray(lengths)
    if xs is not None and xs.ndim == 3:
        t = xs.shape[2] if length_dim == 1 else xs.shape[1]
        lengths = np.broadcast_to(lengths[:, None], (xs.shape[0], t))
    if maxlen is not None:
        m = maxlen
    elif xs is not None:
        m = xs.shape[-1]
    else:
        m = int(lengths.max())
    mask = mod.mask_pad[lengths - 1][..., :m].astype(np.float32)
    if length_dim == 1:
        mask = np.swapaxes(mask, 1, 2)
    return mask


if __name__ == "__main__":
    key = jax.random.PRNGKey(0)
    k1, k2, k3, k4 = jax.random.split(key, 4)

    mod = MakePadMask(max_seq_len=512, flip=True)

    # Case 1: lengths only (B=4), m = max(lengths)  -> small-shape jnp path.
    lengths1 = jax.random.randint(k1, (4,), 1, 9).astype(jnp.int32)
    out1 = jax.block_until_ready(mod(lengths1))
    ref1 = _ref_forward(mod, np.asarray(lengths1))
    assert out1.shape == ref1.shape and out1.dtype == jnp.float32
    np.testing.assert_allclose(np.asarray(out1), ref1)

    # Case 2: 3-D xs, length_dim=-1.  xs: (B=2, T=4, F=16), lengths: (2,).
    xs2 = jax.random.normal(k2, (2, 4, 16), dtype=jnp.float32)
    lengths2 = jax.random.randint(k3, (2,), 1, 17).astype(jnp.int32)
    out2 = jax.block_until_ready(mod(lengths2, xs=xs2, length_dim=-1))
    ref2 = _ref_forward(mod, np.asarray(lengths2), xs=np.asarray(xs2), length_dim=-1)
    assert out2.shape == ref2.shape == (2, 4, 16)
    np.testing.assert_allclose(np.asarray(out2), ref2)

    # Case 3: 3-D xs, length_dim=1 (output transposed to (B, F, T)).
    out3 = jax.block_until_ready(mod(lengths2, xs=xs2, length_dim=1))
    ref3 = _ref_forward(mod, np.asarray(lengths2), xs=np.asarray(xs2), length_dim=1)
    assert out3.shape == ref3.shape
    np.testing.assert_allclose(np.asarray(out3), ref3)

    # Case 4: larger problem -> tiled Pallas path (flip=True): n=1024 rows,
    # maxlen=200 (lane dim padded to 256 in-kernel, grid=(2,) with tile_n=512).
    lengths4 = jax.random.randint(k4, (1024,), 1, 201).astype(jnp.int32)
    out4 = jax.block_until_ready(mod(lengths4, maxlen=200))
    ref4 = _ref_forward(mod, np.asarray(lengths4), maxlen=200)
    assert out4.shape == ref4.shape == (1024, 200)
    np.testing.assert_allclose(np.asarray(out4), ref4)

    # Case 5: same problem with flip=False to cover the other compare branch.
    mod_nf = MakePadMask(max_seq_len=512, flip=False)
    out5 = jax.block_until_ready(mod_nf(lengths4, maxlen=200))
    ref5 = _ref_forward(mod_nf, np.asarray(lengths4), maxlen=200)
    np.testing.assert_allclose(np.asarray(out5), ref5)

    print("KERNEL_OK")
</pallas_src>

<mosaic_0001>
module attributes {stable_mosaic.version = 11 : i64} {
  func.func @kernel(%arg0: i32, %arg1: memref<512x1xi32, #tpu.memory_space<vmem>>, %arg2: memref<512x256xf32, #tpu.memory_space<vmem>>) attributes {dimension_semantics = [#tpu.dimension_semantics<parallel>], iteration_bounds = array<i64: 2>, scalar_prefetch = 0 : i64, scratch_operands = 0 : i64, tpu.core_type = #tpu.core_type<tc>, window_params = [{transform_indices = @transform_0, window_bounds = array<i64: 512, 1>}, {transform_indices = @transform_1, window_bounds = array<i64: 512, 256>}]} {
    %c0 = arith.constant 0 : index
    %c0_0 = arith.constant 0 : index
    %0 = vector.load %arg1[%c0, %c0_0] : memref<512x1xi32, #tpu.memory_space<vmem>>, vector<512x1xi32>
    %1 = tpu.iota {dimensions = array<i32: 1>} : vector<512x256xi32>
    %2 = vector.broadcast %0 : vector<512x1xi32> to vector<512x256xi32>
    %3 = arith.cmpi sge, %1, %2 : vector<512x256xi32>
    %4 = arith.extui %3 : vector<512x256xi1> to vector<512x256xi32>
    %5 = arith.sitofp %4 : vector<512x256xi32> to vector<512x256xf32>
    %c0_1 = arith.constant 0 : index
    %c0_2 = arith.constant 0 : index
    %6 = vector.load %arg2[%c0_1, %c0_2] : memref<512x256xf32, #tpu.memory_space<vmem>>, vector<512x256xf32>
    tpu.vector_store %arg2[%c0_1, %c0_2], %5 {strides = array<i32>} : memref<512x256xf32, #tpu.memory_space<vmem>>, vector<512x256xf32>,
    return
  }
  func.func @transform_0(%arg0: i32) -> (i32, i32) {
    %c0_i32 = arith.constant 0 : i32
    %c0_i32_0 = arith.constant 0 : i32
    return %arg0, %c0_i32 : i32, i32
  }
  func.func @transform_1(%arg0: i32) -> (i32, i32) {
    %c0_i32 = arith.constant 0 : i32
    %c0_i32_0 = arith.constant 0 : i32
    return %arg0, %c0_i32 : i32, i32
  }
}

</mosaic_0001>

<bundles_post_ra>
// kernel: tpu_custom_call.1
= control target key start
LH: loop header
LB: loop body
LE: loop exit
PB: predicated region body
PF: predicated region fallthrough
CT: control target
= control target key end

     0   :  { %6 = vsyncpa [#allocation3], 0  ;;  %s1797_s0 = inlined_call_operand.vmem [shape: s32[1024,1], index: 0, kind: input, shape index: {}]   ;;  %s1798_s1 = inlined_call_operand.hbm [shape: f32[1024,256], index: 1, kind: output, shape index: {}]  }
   0x1   :  { %8 = vsyncpa [#allocation3 + $0x1], 0  ;;  %s1233_s6 = smov 0   ;;  %s1235_s7 = smov 0  }
   0x2   :  { %s1237_s8 = smov 0   ;;  %s1239_s9 = smov 0  }
   0x3 LB: > { %s1254_s10 = sadd.s32 4294967295, %s1216_s9   ;;  %s966_s11 = sadd.s32 4294967294, %s1216_s9   ;;  %s1216_s9 = sphi %s1239_s9, %s1804_s9   ;;  %s1212_s8 = sphi %s1237_s8, %s1803_s8   ;;  %s1208_s7 = sphi %s1235_s7, %s1802_s7   ;;  %s1204_s6 = sphi %s1233_s6, %s1801_s6  }
   0x4   : > { %s1258_s12 = sadd.s32 1, %s1216_s9   ;;  %s47_s13 = sadd.s32 1, %s1212_s8 }
   0x5   : > { %s44_s14 = ssub.s32 %s1216_s9, %s1258_s12  ;;  %p57_p0 = scmp.ne.s32.totalorder %s1212_s8, %s1208_s7 }
   0x6   : > { %p45_p1 = scmp.eq.s32.totalorder %s44_s14, 0  ;;  %p58_p2 = scmp.eq.s32.totalorder %s1254_s10, 1 }
   0x7   : > { %p63_p3 = scmp.ne.s32.totalorder %s1208_s7, %s1204_s6  ;;  %p64_p4 = scmp.eq.s32.totalorder %s966_s11, 1 }
   0x8   : > { %s1269_s15 = scalar_select %p45_p1, %s1212_s8, %s47_s13  }
   0x9   : > { %p1271_p5 = por %p58_p2, %p57_p0  ;;  %p1275_p6 = por %p64_p4, %p63_p3 }
   0xa   : > { %p969_p7 = scmp.ge.s32.totalorder %s1216_s9, 1  ;;  %p91_p8 = scmp.lt.s32.totalorder %s1216_s9, 3 }
   0xc   : > { %p92_p9 = pnand %p969_p7, %p91_p8 }
   0xd   : > { %s971_s18 = sshll.u32 (!%p92_p9), %s1254_s10, 6  ;;  %v1218_v0 = vmov (!%p92_p9), 0   ;;  %v182_v61 = vlaneseq (!%p92_p9)  ;;  %s108_s23 = sand.u32 (!%p92_p9), 1, %s1208_s7  }
   0xe   : > { %95 = sbr.rel (%p92_p9) target bundleno = 295 (0x127), region = 24  ;;  %1153 = vset.pattern.permute.xlu1 (!%p92_p9), %v1218_v0  ;;  %1152 = vset.pattern.permute.xlu0 (!%p92_p9), %v1218_v0  ;;  %p112_p10 = scmp.lt.s32.totalorder (!%p92_p9), %s971_s18, 127 }
   0xf   : > { %v1349_v0 = vand.u32 (!%p92_p9), 127, %v182_v61  ;;  %s970_s24 = sshll.u32 (!%p92_p9), %s108_s23, 10  ;;  %s1108_s26 = sshll.u32 (!%p92_p9), %s1254_s10, 14 }
  0x10   : > { %s1367_s25 = scalar_lea.vmem (!%p92_p9), [#allocation2], %s970_s24  ;;  %s1738_s30 = scalar_lea.hbm (!%p92_p9), %s1798_s1, %s1108_s26 }
  0x11   : > { %s904_s27 = sshll.u32 (!%p92_p9), %s1367_s25, 4  ;;  %s1756_s2 = scalar_lea.sflag (!%p92_p9), [#allocation3], %s108_s23  ;;  %s1740_s27 = int_to_ptr.vmem [resolvable:$true] %s904_s27 }
  0x12   : > { %s1154_s3 = scalar_lea.vmem (!%p92_p9), %s1740_s27, 16384  ;;  %s1220_s4 = smov (!%p92_p9), [#allocation2]  }
  0x13   : > { %p1155_p11 = scmp.ne.s32.totalorder (!%p92_p9), %s1740_s27, %s1154_s3  ;;  %s1158_s5 = sshll.u32 (!%p92_p9), %s1220_s4, 4  ;;  %s1159_s5 = int_to_ptr.vmem [resolvable:$false] %s1158_s5 }
  0x14   : > { %s1160_s10 = scalar_lea.vmem (!%p92_p9), %s1159_s5, 32768  ;;  %p1161_p0 = scmp.lt.s32.totalorder (!%p92_p9), %s1740_s27, %s1159_s5 }
  0x15   : > { %s1806_s18 = smov (!%p112_p10, %s971_s18), 127  ;;  %p1156_p12 = pnand %p1155_p11, %p1271_p5 }
  0x16   : > { %s972_s19 = sshll.u32 %s1806_s18, 3  ;;  %p1162_p1 = scmp.lt.s32.totalorder %s1160_s10, %s1154_s3 }
  0x17   : > { %s1285_s22 = scalar_lea.vmem %s1797_s0, %s972_s19  ;;  %p1157_p13 = pneg %p1156_p12 }
  0x18   : > { %v120_v1 = vld [vmem:[%s1285_s22 + $0x10] sm:$0xff]  ;;  %v118_v2 = vld [vmem:[%s1285_s22] sm:$0xff]  ;;  %v121_v3 = vld [vmem:[%s1285_s22 + $0x18] sm:$0xff]  ;;  %p1163_p2 = por %p1162_p1, %p1161_p0 }
  0x19   : > { %192 = vperm.xlu1 %1153, %v120_v1   ;;  %186 = vperm.xlu0 %1152, %v118_v2   ;;  %v119_v4 = vld [vmem:[%s1285_s22 + $0x8] sm:$0xff]  ;;  %v122_v6 = vld [vmem:[%s1285_s22 + $0x20] sm:$0xff]  ;;  %v125_v7 = vld [vmem:[%s1285_s22 + $0x38] sm:$0xff] }
  0x1a   : > { %v123_v5 = vld [vmem:[%s1285_s22 + $0x28] sm:$0xff]  ;;  %v124_v8 = vld [vmem:[%s1285_s22 + $0x30] sm:$0xff]  ;;  %v126_v10 = vld [vmem:[%s1285_s22 + $0x40] sm:$0xff]  ;;  %p1164_p3 = pnand %p1163_p2, %p1157_p13 }
  0x1b   : > { %v127_v9 = vld [vmem:[%s1285_s22 + $0x48] sm:$0xff]  ;;  %v129_v11 = vld [vmem:[%s1285_s22 + $0x58] sm:$0xff]  ;;  %v128_v12 = vld [vmem:[%s1285_s22 + $0x50] sm:$0xff] }
  0x1c   : > { %v131_v13 = vld [vmem:[%s1285_s22 + $0x68] sm:$0xff]  ;;  %v130_v14 = vld [vmem:[%s1285_s22 + $0x60] sm:$0xff]  ;;  %v133_v15 = vld [vmem:[%s1285_s22 + $0x78] sm:$0xff] }
  0x1d   : > { %195 = vperm.xlu1 %1153, %v121_v3   ;;  %189 = vperm.xlu0 %1152, %v119_v4   ;;  %v132_v16 = vld [vmem:[%s1285_s22 + $0x70] sm:$0xff]  ;;  %v135_v17 = vld [vmem:[%s1285_s22 + $0x88] sm:$0xff]  ;;  %v134_v18 = vld [vmem:[%s1285_s22 + $0x80] sm:$0xff]  ;;  %v1355_v3 = vadd.s32 128, %v1349_v0 }
  0x1e   : > { %v137_v19 = vld [vmem:[%s1285_s22 + $0x98] sm:$0xff]  ;;  %v136_v20 = vld [vmem:[%s1285_s22 + $0x90] sm:$0xff]  ;;  %v139_v21 = vld [vmem:[%s1285_s22 + $0xa8] sm:$0xff] }
  0x1f   : > { %v138_v22 = vld [vmem:[%s1285_s22 + $0xa0] sm:$0xff]  ;;  %v141_v23 = vld [vmem:[%s1285_s22 + $0xb8] sm:$0xff]  ;;  %v140_v24 = vld [vmem:[%s1285_s22 + $0xb0] sm:$0xff] }
  0x20   : > { %v143_v25 = vld [vmem:[%s1285_s22 + $0xc8] sm:$0xff]  ;;  %v142_v26 = vld [vmem:[%s1285_s22 + $0xc0] sm:$0xff]  ;;  %v145_v27 = vld [vmem:[%s1285_s22 + $0xd8] sm:$0xff] }
  0x21   : > { %201 = vperm.xlu1 %1153, %v123_v5   ;;  %198 = vperm.xlu0 %1152, %v122_v6   ;;  %v144_v28 = vld [vmem:[%s1285_s22 + $0xd0] sm:$0xff]  ;;  %v147_v29 = vld [vmem:[%s1285_s22 + $0xe8] sm:$0xff]  ;;  %v146_v30 = vld [vmem:[%s1285_s22 + $0xe0] sm:$0xff]  ;;  %v1219_v6 = vmov 0.0  }
  0x22   : > { %v149_v31 = vld [vmem:[%s1285_s22 + $0xf8] sm:$0xff]  ;;  %v148_v32 = vld [vmem:[%s1285_s22 + $0xf0] sm:$0xff]  ;;  %v151_v33 = vld [vmem:[%s1285_s22 + $0x108] sm:$0xff] }
  0x23   : > { %v150_v34 = vld [vmem:[%s1285_s22 + $0x100] sm:$0xff]  ;;  %v153_v35 = vld [vmem:[%s1285_s22 + $0x118] sm:$0xff]  ;;  %v152_v36 = vld [vmem:[%s1285_s22 + $0x110] sm:$0xff] }
  0x24   : > { %v155_v37 = vld [vmem:[%s1285_s22 + $0x128] sm:$0xff]  ;;  %v154_v38 = vld [vmem:[%s1285_s22 + $0x120] sm:$0xff]  ;;  %v157_v39 = vld [vmem:[%s1285_s22 + $0x138] sm:$0xff] }
  0x25   : > { %207 = vperm.xlu1 %1153, %v125_v7   ;;  %204 = vperm.xlu0 %1152, %v124_v8   ;;  %v156_v40 = vld [vmem:[%s1285_s22 + $0x130] sm:$0xff]  ;;  %v159_v41 = vld [vmem:[%s1285_s22 + $0x148] sm:$0xff]  ;;  %v158_v42 = vld [vmem:[%s1285_s22 + $0x140] sm:$0xff] }
  0x26   : > { %v161_v43 = vld [vmem:[%s1285_s22 + $0x158] sm:$0xff]  ;;  %v160_v44 = vld [vmem:[%s1285_s22 + $0x150] sm:$0xff]  ;;  %v163_v45 = vld [vmem:[%s1285_s22 + $0x168] sm:$0xff] }
  0x27   : > { %v162_v46 = vld [vmem:[%s1285_s22 + $0x160] sm:$0xff]  ;;  %v165_v47 = vld [vmem:[%s1285_s22 + $0x178] sm:$0xff]  ;;  %v164_v48 = vld [vmem:[%s1285_s22 + $0x170] sm:$0xff] }
  0x28   : > { %v167_v49 = vld [vmem:[%s1285_s22 + $0x188] sm:$0xff]  ;;  %v166_v50 = vld [vmem:[%s1285_s22 + $0x180] sm:$0xff]  ;;  %v169_v51 = vld [vmem:[%s1285_s22 + $0x198] sm:$0xff] }
  0x29   : > { %213 = vperm.xlu1 %1153, %v127_v9   ;;  %210 = vperm.xlu0 %1152, %v126_v10   ;;  %v168_v52 = vld [vmem:[%s1285_s22 + $0x190] sm:$0xff]  ;;  %v171_v53 = vld [vmem:[%s1285_s22 + $0x1a8] sm:$0xff]  ;;  %v170_v54 = vld [vmem:[%s1285_s22 + $0x1a0] sm:$0xff] }
  0x2a   : > { %v173_v55 = vld [vmem:[%s1285_s22 + $0x1b8] sm:$0xff]  ;;  %v172_v56 = vld [vmem:[%s1285_s22 + $0x1b0] sm:$0xff]  ;;  %v175_v57 = vld [vmem:[%s1285_s22 + $0x1c8] sm:$0xff] }
  0x2b   : > { %v174_v58 = vld [vmem:[%s1285_s22 + $0x1c0] sm:$0xff]  ;;  %v177_v59 = vld [vmem:[%s1285_s22 + $0x1d8] sm:$0xff]  ;;  %v176_v60 = vld [vmem:[%s1285_s22 + $0x1d0] sm:$0xff] }
  0x2c   : > { %v179_v62 = vld [vmem:[%s1285_s22 + $0x1e8] sm:$0xff]  ;;  %v178_v63 = vld [vmem:[%s1285_s22 + $0x1e0] sm:$0xff]  ;;  %v181_v1 = vld [vmem:[%s1285_s22 + $0x1f8] sm:$0xff] }
  0x2d   : > { %219 = vperm.xlu1 %1153, %v129_v11   ;;  %216 = vperm.xlu0 %1152, %v128_v12   ;;  %v180_v2 = vld [vmem:[%s1285_s22 + $0x1f0] sm:$0xff] }
  0x31   : > { %225 = vperm.xlu1 %1153, %v131_v13   ;;  %222 = vperm.xlu0 %1152, %v130_v14  }
  0x35   : > { %231 = vperm.xlu1 %1153, %v133_v15   ;;  %228 = vperm.xlu0 %1152, %v132_v16  }
  0x39   : > { %237 = vperm.xlu1 %1153, %v135_v17   ;;  %234 = vperm.xlu0 %1152, %v134_v18  }
  0x3d   : > { %243 = vperm.xlu1 %1153, %v137_v19   ;;  %240 = vperm.xlu0 %1152, %v136_v20  }
  0x41   : > { %249 = vperm.xlu1 %1153, %v139_v21   ;;  %246 = vperm.xlu0 %1152, %v138_v22  }
  0x45   : > { %255 = vperm.xlu1 %1153, %v141_v23   ;;  %252 = vperm.xlu0 %1152, %v140_v24  }
  0x49   : > { %261 = vperm.xlu1 %1153, %v143_v25   ;;  %258 = vperm.xlu0 %1152, %v142_v26  }
  0x4d   : > { %267 = vperm.xlu1 %1153, %v145_v27   ;;  %264 = vperm.xlu0 %1152, %v144_v28  }
  0x51   : > { %273 = vperm.xlu1 %1153, %v147_v29   ;;  %270 = vperm.xlu0 %1152, %v146_v30  }
  0x55   : > { %279 = vperm.xlu1 %1153, %v149_v31   ;;  %276 = vperm.xlu0 %1152, %v148_v32  }
  0x59   : > { %285 = vperm.xlu1 %1153, %v151_v33   ;;  %282 = vperm.xlu0 %1152, %v150_v34  }
  0x5d   : > { %291 = vperm.xlu1 %1153, %v153_v35   ;;  %288 = vperm.xlu0 %1152, %v152_v36  }
  0x61   : > { %297 = vperm.xlu1 %1153, %v155_v37   ;;  %294 = vperm.xlu0 %1152, %v154_v38  }
  0x65   : > { %303 = vperm.xlu1 %1153, %v157_v39   ;;  %300 = vperm.xlu0 %1152, %v156_v40  }
  0x69   : > { %309 = vperm.xlu1 %1153, %v159_v41   ;;  %306 = vperm.xlu0 %1152, %v158_v42  }
  0x6d   : > { %315 = vperm.xlu1 %1153, %v161_v43   ;;  %312 = vperm.xlu0 %1152, %v160_v44  }
  0x71   : > { %321 = vperm.xlu1 %1153, %v163_v45   ;;  %318 = vperm.xlu0 %1152, %v162_v46  }
  0x75   : > { %327 = vperm.xlu1 %1153, %v165_v47   ;;  %324 = vperm.xlu0 %1152, %v164_v48  }
  0x79   : > { %333 = vperm.xlu1 %1153, %v167_v49   ;;  %330 = vperm.xlu0 %1152, %v166_v50  }
  0x7d   : > { %339 = vperm.xlu1 %1153, %v169_v51   ;;  %336 = vperm.xlu0 %1152, %v168_v52  }
  0x81   : > { %345 = vperm.xlu1 %1153, %v171_v53   ;;  %342 = vperm.xlu0 %1152, %v170_v54  }
  0x85   : > { %351 = vperm.xlu1 %1153, %v173_v55   ;;  %348 = vperm.xlu0 %1152, %v172_v56  }
  0x89   : > { %357 = vperm.xlu1 %1153, %v175_v57   ;;  %354 = vperm.xlu0 %1152, %v174_v58  }
  0x8d   : > { %363 = vperm.xlu1 %1153, %v177_v59   ;;  %360 = vperm.xlu0 %1152, %v176_v60  }
  0x91   : > { %369 = vperm.xlu1 %1153, %v179_v62   ;;  %366 = vperm.xlu0 %1152, %v178_v63  }
  0x95   : > { %375 = vperm.xlu1 %1153, %v181_v1   ;;  %372 = vperm.xlu0 %1152, %v180_v2  }
  0x98   : > { %v193_v4 = vpop.permute.xlu1 %192  ;;  %v187_v5 = vpop.permute.xlu0 %186 }
  0x99   : > { %vm381_vm0 = vcmp.ge.s32.totalorder %v1349_v0, %v193_v4  ;;  %vm382_vm1 = vcmp.ge.s32.totalorder %v1355_v3, %v193_v4  ;;  %vm377_vm2 = vcmp.ge.s32.totalorder %v1349_v0, %v187_v5  ;;  %vm378_vm3 = vcmp.ge.s32.totalorder %v1355_v3, %v187_v5 }
  0x9a   : > { %v977_v7 = vsel %vm381_vm0, 1.0, %v1219_v6  ;;  %v978_v8 = vsel %vm382_vm1, 1.0, %v1219_v6  ;;  %v973_v9 = vsel %vm377_vm2, 1.0, %v1219_v6  ;;  %v974_v10 = vsel %vm378_vm3, 1.0, %v1219_v6 }
  0x9b   : > { %765 = vst [vmem:[%s1367_s25 + $0x20] sm:$0xff] %v977_v7  ;;  %766 = vst [vmem:[%s1367_s25 + $0x28] sm:$0xff] %v978_v8 }
  0x9c   : > { %761 = vst [vmem:[%s1367_s25] sm:$0xff] %v973_v9  ;;  %762 = vst [vmem:[%s1367_s25 + $0x8] sm:$0xff] %v974_v10  ;;  %v196_v11 = vpop.permute.xlu1 %195  ;;  %v190_v12 = vpop.permute.xlu0 %189 }
  0x9d   : > { %vm383_vm4 = vcmp.ge.s32.totalorder %v1349_v0, %v196_v11  ;;  %vm384_vm5 = vcmp.ge.s32.totalorder %v1355_v3, %v196_v11  ;;  %vm379_vm6 = vcmp.ge.s32.totalorder %v1349_v0, %v190_v12  ;;  %vm380_vm7 = vcmp.ge.s32.totalorder %v1355_v3, %v190_v12 }
  0x9e   : > { %v979_v13 = vsel %vm383_vm4, 1.0, %v1219_v6  ;;  %v980_v14 = vsel %vm384_vm5, 1.0, %v1219_v6  ;;  %v975_v15 = vsel %vm379_vm6, 1.0, %v1219_v6  ;;  %v976_v16 = vsel %vm380_vm7, 1.0, %v1219_v6 }
  0x9f   : > { %767 = vst [vmem:[%s1367_s25 + $0x30] sm:$0xff] %v979_v13  ;;  %768 = vst [vmem:[%s1367_s25 + $0x38] sm:$0xff] %v980_v14 }
  0xa0   : > { %763 = vst [vmem:[%s1367_s25 + $0x10] sm:$0xff] %v975_v15  ;;  %764 = vst [vmem:[%s1367_s25 + $0x18] sm:$0xff] %v976_v16  ;;  %v202_v17 = vpop.permute.xlu1 %201  ;;  %v199_v18 = vpop.permute.xlu0 %198 }
  0xa1   : > { %vm387_vm8 = vcmp.ge.s32.totalorder %v1349_v0, %v202_v17  ;;  %vm388_vm9 = vcmp.ge.s32.totalorder %v1355_v3, %v202_v17  ;;  %vm385_vm10 = vcmp.ge.s32.totalorder %v1349_v0, %v199_v18  ;;  %vm386_vm11 = vcmp.ge.s32.totalorder %v1355_v3, %v199_v18 }
  0xa2   : > { %v983_v19 = vsel %vm387_vm8, 1.0, %v1219_v6  ;;  %v984_v20 = vsel %vm388_vm9, 1.0, %v1219_v6  ;;  %v981_v21 = vsel %vm385_vm10, 1.0, %v1219_v6  ;;  %v982_v22 = vsel %vm386_vm11, 1.0, %v1219_v6 }
  0xa3   : > { %771 = vst [vmem:[%s1367_s25 + $0x50] sm:$0xff] %v983_v19  ;;  %772 = vst [vmem:[%s1367_s25 + $0x58] sm:$0xff] %v984_v20 }
  0xa4   : > { %769 = vst [vmem:[%s1367_s25 + $0x40] sm:$0xff] %v981_v21  ;;  %770 = vst [vmem:[%s1367_s25 + $0x48] sm:$0xff] %v982_v22  ;;  %v208_v23 = vpop.permute.xlu1 %207  ;;  %v205_v24 = vpop.permute.xlu0 %204 }
  0xa5   : > { %vm391_vm12 = vcmp.ge.s32.totalorder %v1349_v0, %v208_v23  ;;  %vm392_vm13 = vcmp.ge.s32.totalorder %v1355_v3, %v208_v23  ;;  %vm389_vm14 = vcmp.ge.s32.totalorder %v1349_v0, %v205_v24  ;;  %vm390_vm15 = vcmp.ge.s32.totalorder %v1355_v3, %v205_v24 }
  0xa6   : > { %v987_v25 = vsel %vm391_vm12, 1.0, %v1219_v6  ;;  %v988_v26 = vsel %vm392_vm13, 1.0, %v1219_v6  ;;  %v985_v27 = vsel %vm389_vm14, 1.0, %v1219_v6  ;;  %v986_v28 = vsel %vm390_vm15, 1.0, %v1219_v6 }
  0xa7   : > { %775 = vst [vmem:[%s1367_s25 + $0x70] sm:$0xff] %v987_v25  ;;  %776 = vst [vmem:[%s1367_s25 + $0x78] sm:$0xff] %v988_v26 }
  0xa8   : > { %773 = vst [vmem:[%s1367_s25 + $0x60] sm:$0xff] %v985_v27  ;;  %774 = vst [vmem:[%s1367_s25 + $0x68] sm:$0xff] %v986_v28  ;;  %v214_v29 = vpop.permute.xlu1 %213  ;;  %v211_v30 = vpop.permute.xlu0 %210 }
  0xa9   : > { %vm395_vm0 = vcmp.ge.s32.totalorder %v1349_v0, %v214_v29  ;;  %vm396_vm1 = vcmp.ge.s32.totalorder %v1355_v3, %v214_v29  ;;  %vm393_vm2 = vcmp.ge.s32.totalorder %v1349_v0, %v211_v30  ;;  %vm394_vm3 = vcmp.ge.s32.totalorder %v1355_v3, %v211_v30 }
  0xaa   : > { %v991_v31 = vsel %vm395_vm0, 1.0, %v1219_v6  ;;  %v992_v32 = vsel %vm396_vm1, 1.0, %v1219_v6  ;;  %v989_v33 = vsel %vm393_vm2, 1.0, %v1219_v6  ;;  %v990_v34 = vsel %vm394_vm3, 1.0, %v1219_v6 }
  0xab   : > { %779 = vst [vmem:[%s1367_s25 + $0x90] sm:$0xff] %v991_v31  ;;  %780 = vst [vmem:[%s1367_s25 + $0x98] sm:$0xff] %v992_v32 }
  0xac   : > { %777 = vst [vmem:[%s1367_s25 + $0x80] sm:$0xff] %v989_v33  ;;  %778 = vst [vmem:[%s1367_s25 + $0x88] sm:$0xff] %v990_v34  ;;  %v220_v35 = vpop.permute.xlu1 %219  ;;  %v217_v36 = vpop.permute.xlu0 %216 }
  0xad   : > { %vm399_vm4 = vcmp.ge.s32.totalorder %v1349_v0, %v220_v35  ;;  %vm400_vm5 = vcmp.ge.s32.totalorder %v1355_v3, %v220_v35  ;;  %vm397_vm6 = vcmp.ge.s32.totalorder %v1349_v0, %v217_v36  ;;  %vm398_vm7 = vcmp.ge.s32.totalorder %v1355_v3, %v217_v36 }
  0xae   : > { %v995_v37 = vsel %vm399_vm4, 1.0, %v1219_v6  ;;  %v996_v38 = vsel %vm400_vm5, 1.0, %v1219_v6  ;;  %v993_v39 = vsel %vm397_vm6, 1.0, %v1219_v6  ;;  %v994_v40 = vsel %vm398_vm7, 1.0, %v1219_v6 }
  0xaf   : > { %783 = vst [vmem:[%s1367_s25 + $0xb0] sm:$0xff] %v995_v37  ;;  %784 = vst [vmem:[%s1367_s25 + $0xb8] sm:$0xff] %v996_v38 }
  0xb0   : > { %781 = vst [vmem:[%s1367_s25 + $0xa0] sm:$0xff] %v993_v39  ;;  %782 = vst [vmem:[%s1367_s25 + $0xa8] sm:$0xff] %v994_v40  ;;  %v226_v41 = vpop.permute.xlu1 %225  ;;  %v223_v42 = vpop.permute.xlu0 %222 }
  0xb1   : > { %vm403_vm8 = vcmp.ge.s32.totalorder %v1349_v0, %v226_v41  ;;  %vm404_vm9 = vcmp.ge.s32.totalorder %v1355_v3, %v226_v41  ;;  %vm401_vm10 = vcmp.ge.s32.totalorder %v1349_v0, %v223_v42  ;;  %vm402_vm11 = vcmp.ge.s32.totalorder %v1355_v3, %v223_v42 }
  0xb2   : > { %v999_v43 = vsel %vm403_vm8, 1.0, %v1219_v6  ;;  %v1000_v44 = vsel %vm404_vm9, 1.0, %v1219_v6  ;;  %v997_v45 = vsel %vm401_vm10, 1.0, %v1219_v6  ;;  %v998_v46 = vsel %vm402_vm11, 1.0, %v1219_v6 }
  0xb3   : > { %787 = vst [vmem:[%s1367_s25 + $0xd0] sm:$0xff] %v999_v43  ;;  %788 = vst [vmem:[%s1367_s25 + $0xd8] sm:$0xff] %v1000_v44 }
  0xb4   : > { %785 = vst [vmem:[%s1367_s25 + $0xc0] sm:$0xff] %v997_v45  ;;  %786 = vst [vmem:[%s1367_s25 + $0xc8] sm:$0xff] %v998_v46  ;;  %v232_v47 = vpop.permute.xlu1 %231  ;;  %v229_v48 = vpop.permute.xlu0 %228 }
  0xb5   : > { %vm407_vm12 = vcmp.ge.s32.totalorder %v1349_v0, %v232_v47  ;;  %vm408_vm13 = vcmp.ge.s32.totalorder %v1355_v3, %v232_v47  ;;  %vm405_vm14 = vcmp.ge.s32.totalorder %v1349_v0, %v229_v48  ;;  %vm406_vm15 = vcmp.ge.s32.totalorder %v1355_v3, %v229_v48 }
  0xb6   : > { %v1003_v49 = vsel %vm407_vm12, 1.0, %v1219_v6  ;;  %v1004_v50 = vsel %vm408_vm13, 1.0, %v1219_v6  ;;  %v1001_v51 = vsel %vm405_vm14, 1.0, %v1219_v6  ;;  %v1002_v52 = vsel %vm406_vm15, 1.0, %v1219_v6 }
  0xb7   : > { %791 = vst [vmem:[%s1367_s25 + $0xf0] sm:$0xff] %v1003_v49  ;;  %792 = vst [vmem:[%s1367_s25 + $0xf8] sm:$0xff] %v1004_v50 }
  0xb8   : > { %789 = vst [vmem:[%s1367_s25 + $0xe0] sm:$0xff] %v1001_v51  ;;  %790 = vst [vmem:[%s1367_s25 + $0xe8] sm:$0xff] %v1002_v52  ;;  %v238_v53 = vpop.permute.xlu1 %237  ;;  %v235_v54 = vpop.permute.xlu0 %234 }
  0xb9   : > { %vm411_vm0 = vcmp.ge.s32.totalorder %v1349_v0, %v238_v53  ;;  %vm412_vm1 = vcmp.ge.s32.totalorder %v1355_v3, %v238_v53  ;;  %vm409_vm2 = vcmp.ge.s32.totalorder %v1349_v0, %v235_v54  ;;  %vm410_vm3 = vcmp.ge.s32.totalorder %v1355_v3, %v235_v54 }
  0xba   : > { %v1007_v55 = vsel %vm411_vm0, 1.0, %v1219_v6  ;;  %v1008_v56 = vsel %vm412_vm1, 1.0, %v1219_v6  ;;  %v1005_v57 = vsel %vm409_vm2, 1.0, %v1219_v6  ;;  %v1006_v58 = vsel %vm410_vm3, 1.0, %v1219_v6 }
  0xbb   : > { %795 = vst [vmem:[%s1367_s25 + $0x110] sm:$0xff] %v1007_v55  ;;  %796 = vst [vmem:[%s1367_s25 + $0x118] sm:$0xff] %v1008_v56 }
  0xbc   : > { %793 = vst [vmem:[%s1367_s25 + $0x100] sm:$0xff] %v1005_v57  ;;  %794 = vst [vmem:[%s1367_s25 + $0x108] sm:$0xff] %v1006_v58  ;;  %v244_v59 = vpop.permute.xlu1 %243  ;;  %v241_v60 = vpop.permute.xlu0 %240 }
  0xbd   : > { %vm415_vm4 = vcmp.ge.s32.totalorder %v1349_v0, %v244_v59  ;;  %vm416_vm5 = vcmp.ge.s32.totalorder %v1355_v3, %v244_v59  ;;  %vm413_vm6 = vcmp.ge.s32.totalorder %v1349_v0, %v241_v60  ;;  %vm414_vm7 = vcmp.ge.s32.totalorder %v1355_v3, %v241_v60 }
  0xbe   : > { %v1011_v61 = vsel %vm415_vm4, 1.0, %v1219_v6  ;;  %v1012_v62 = vsel %vm416_vm5, 1.0, %v1219_v6  ;;  %v1009_v63 = vsel %vm413_vm6, 1.0, %v1219_v6  ;;  %v1010_v1 = vsel %vm414_vm7, 1.0, %v1219_v6 }
  0xbf   : > { %799 = vst [vmem:[%s1367_s25 + $0x130] sm:$0xff] %v1011_v61  ;;  %800 = vst [vmem:[%s1367_s25 + $0x138] sm:$0xff] %v1012_v62 }
  0xc0   : > { %797 = vst [vmem:[%s1367_s25 + $0x120] sm:$0xff] %v1009_v63  ;;  %798 = vst [vmem:[%s1367_s25 + $0x128] sm:$0xff] %v1010_v1  ;;  %v250_v2 = vpop.permute.xlu1 %249  ;;  %v247_v4 = vpop.permute.xlu0 %246 }
  0xc1   : > { %vm419_vm8 = vcmp.ge.s32.totalorder %v1349_v0, %v250_v2  ;;  %vm420_vm9 = vcmp.ge.s32.totalorder %v1355_v3, %v250_v2  ;;  %vm417_vm10 = vcmp.ge.s32.totalorder %v1349_v0, %v247_v4  ;;  %vm418_vm11 = vcmp.ge.s32.totalorder %v1355_v3, %v247_v4 }
  0xc2   : > { %v1015_v5 = vsel %vm419_vm8, 1.0, %v1219_v6  ;;  %v1016_v7 = vsel %vm420_vm9, 1.0, %v1219_v6  ;;  %v1013_v8 = vsel %vm417_vm10, 1.0, %v1219_v6  ;;  %v1014_v9 = vsel %vm418_vm11, 1.0, %v1219_v6 }
  0xc3   : > { %803 = vst [vmem:[%s1367_s25 + $0x150] sm:$0xff] %v1015_v5  ;;  %804 = vst [vmem:[%s1367_s25 + $0x158] sm:$0xff] %v1016_v7 }
  0xc4   : > { %801 = vst [vmem:[%s1367_s25 + $0x140] sm:$0xff] %v1013_v8  ;;  %802 = vst [vmem:[%s1367_s25 + $0x148] sm:$0xff] %v1014_v9  ;;  %v256_v10 = vpop.permute.xlu1 %255  ;;  %v253_v11 = vpop.permute.xlu0 %252 }
  0xc5   : > { %vm423_vm12 = vcmp.ge.s32.totalorder %v1349_v0, %v256_v10  ;;  %vm424_vm13 = vcmp.ge.s32.totalorder %v1355_v3, %v256_v10  ;;  %vm421_vm14 = vcmp.ge.s32.totalorder %v1349_v0, %v253_v11  ;;  %vm422_vm15 = vcmp.ge.s32.totalorder %v1355_v3, %v253_v11 }
  0xc6   : > { %v1019_v12 = vsel %vm423_vm12, 1.0, %v1219_v6  ;;  %v1020_v13 = vsel %vm424_vm13, 1.0, %v1219_v6  ;;  %v1017_v14 = vsel %vm421_vm14, 1.0, %v1219_v6  ;;  %v1018_v15 = vsel %vm422_vm15, 1.0, %v1219_v6 }
  0xc7   : > { %807 = vst [vmem:[%s1367_s25 + $0x170] sm:$0xff] %v1019_v12  ;;  %808 = vst [vmem:[%s1367_s25 + $0x178] sm:$0xff] %v1020_v13 }
  0xc8   : > { %805 = vst [vmem:[%s1367_s25 + $0x160] sm:$0xff] %v1017_v14  ;;  %806 = vst [vmem:[%s1367_s25 + $0x168] sm:$0xff] %v1018_v15  ;;  %v262_v16 = vpop.permute.xlu1 %261  ;;  %v259_v17 = vpop.permute.xlu0 %258 }
  0xc9   : > { %vm427_vm0 = vcmp.ge.s32.totalorder %v1349_v0, %v262_v16  ;;  %vm428_vm1 = vcmp.ge.s32.totalorder %v1355_v3, %v262_v16  ;;  %vm425_vm2 = vcmp.ge.s32.totalorder %v1349_v0, %v259_v17  ;;  %vm426_vm3 = vcmp.ge.s32.totalorder %v1355_v3, %v259_v17 }
  0xca   : > { %v1023_v18 = vsel %vm427_vm0, 1.0, %v1219_v6  ;;  %v1024_v19 = vsel %vm428_vm1, 1.0, %v1219_v6  ;;  %v1021_v20 = vsel %vm425_vm2, 1.0, %v1219_v6  ;;  %v1022_v21 = vsel %vm426_vm3, 1.0, %v1219_v6 }
  0xcb   : > { %811 = vst [vmem:[%s1367_s25 + $0x190] sm:$0xff] %v1023_v18  ;;  %812 = vst [vmem:[%s1367_s25 + $0x198] sm:$0xff] %v1024_v19 }
  0xcc   : > { %809 = vst [vmem:[%s1367_s25 + $0x180] sm:$0xff] %v1021_v20  ;;  %810 = vst [vmem:[%s1367_s25 + $0x188] sm:$0xff] %v1022_v21  ;;  %v268_v22 = vpop.permute.xlu1 %267  ;;  %v265_v23 = vpop.permute.xlu0 %264 }
  0xcd   : > { %vm431_vm4 = vcmp.ge.s32.totalorder %v1349_v0, %v268_v22  ;;  %vm432_vm5 = vcmp.ge.s32.totalorder %v1355_v3, %v268_v22  ;;  %vm429_vm6 = vcmp.ge.s32.totalorder %v1349_v0, %v265_v23  ;;  %vm430_vm7 = vcmp.ge.s32.totalorder %v1355_v3, %v265_v23 }
  0xce   : > { %v1027_v24 = vsel %vm431_vm4, 1.0, %v1219_v6  ;;  %v1028_v25 = vsel %vm432_vm5, 1.0, %v1219_v6  ;;  %v1025_v26 = vsel %vm429_vm6, 1.0, %v1219_v6  ;;  %v1026_v27 = vsel %vm430_vm7, 1.0, %v1219_v6 }
  0xcf   : > { %815 = vst [vmem:[%s1367_s25 + $0x1b0] sm:$0xff] %v1027_v24  ;;  %816 = vst [vmem:[%s1367_s25 + $0x1b8] sm:$0xff] %v1028_v25 }
  0xd0   : > { %813 = vst [vmem:[%s1367_s25 + $0x1a0] sm:$0xff] %v1025_v26  ;;  %814 = vst [vmem:[%s1367_s25 + $0x1a8] sm:$0xff] %v1026_v27  ;;  %v274_v28 = vpop.permute.xlu1 %273  ;;  %v271_v29 = vpop.permute.xlu0 %270 }
  0xd1   : > { %vm435_vm8 = vcmp.ge.s32.totalorder %v1349_v0, %v274_v28  ;;  %vm436_vm9 = vcmp.ge.s32.totalorder %v1355_v3, %v274_v28  ;;  %vm433_vm10 = vcmp.ge.s32.totalorder %v1349_v0, %v271_v29  ;;  %vm434_vm11 = vcmp.ge.s32.totalorder %v1355_v3, %v271_v29 }
  0xd2   : > { %v1031_v30 = vsel %vm435_vm8, 1.0, %v1219_v6  ;;  %v1032_v31 = vsel %vm436_vm9, 1.0, %v1219_v6  ;;  %v1029_v32 = vsel %vm433_vm10, 1.0, %v1219_v6  ;;  %v1030_v33 = vsel %vm434_vm11, 1.0, %v1219_v6 }
  0xd3   : > { %819 = vst [vmem:[%s1367_s25 + $0x1d0] sm:$0xff] %v1031_v30  ;;  %820 = vst [vmem:[%s1367_s25 + $0x1d8] sm:$0xff] %v1032_v31 }
  0xd4   : > { %817 = vst [vmem:[%s1367_s25 + $0x1c0] sm:$0xff] %v1029_v32  ;;  %818 = vst [vmem:[%s1367_s25 + $0x1c8] sm:$0xff] %v1030_v33  ;;  %v280_v34 = vpop.permute.xlu1 %279  ;;  %v277_v35 = vpop.permute.xlu0 %276 }
  0xd5   : > { %vm439_vm12 = vcmp.ge.s32.totalorder %v1349_v0, %v280_v34  ;;  %vm440_vm13 = vcmp.ge.s32.totalorder %v1355_v3, %v280_v34  ;;  %vm437_vm14 = vcmp.ge.s32.totalorder %v1349_v0, %v277_v35  ;;  %vm438_vm15 = vcmp.ge.s32.totalorder %v1355_v3, %v277_v35 }
  0xd6   : > { %v1035_v36 = vsel %vm439_vm12, 1.0, %v1219_v6  ;;  %v1036_v37 = vsel %vm440_vm13, 1.0, %v1219_v6  ;;  %v1033_v38 = vsel %vm437_vm14, 1.0, %v1219_v6  ;;  %v1034_v39 = vsel %vm438_vm15, 1.0, %v1219_v6 }
  0xd7   : > { %823 = vst [vmem:[%s1367_s25 + $0x1f0] sm:$0xff] %v1035_v36  ;;  %824 = vst [vmem:[%s1367_s25 + $0x1f8] sm:$0xff] %v1036_v37 }
  0xd8   : > { %821 = vst [vmem:[%s1367_s25 + $0x1e0] sm:$0xff] %v1033_v38  ;;  %822 = vst [vmem:[%s1367_s25 + $0x1e8] sm:$0xff] %v1034_v39  ;;  %v286_v40 = vpop.permute.xlu1 %285  ;;  %v283_v41 = vpop.permute.xlu0 %282 }
  0xd9   : > { %vm443_vm0 = vcmp.ge.s32.totalorder %v1349_v0, %v286_v40  ;;  %vm444_vm1 = vcmp.ge.s32.totalorder %v1355_v3, %v286_v40  ;;  %vm441_vm2 = vcmp.ge.s32.totalorder %v1349_v0, %v283_v41  ;;  %vm442_vm3 = vcmp.ge.s32.totalorder %v1355_v3, %v283_v41 }
  0xda   : > { %v1039_v42 = vsel %vm443_vm0, 1.0, %v1219_v6  ;;  %v1040_v43 = vsel %vm444_vm1, 1.0, %v1219_v6  ;;  %v1037_v44 = vsel %vm441_vm2, 1.0, %v1219_v6  ;;  %v1038_v45 = vsel %vm442_vm3, 1.0, %v1219_v6 }
  0xdb   : > { %827 = vst [vmem:[%s1367_s25 + $0x210] sm:$0xff] %v1039_v42  ;;  %828 = vst [vmem:[%s1367_s25 + $0x218] sm:$0xff] %v1040_v43 }
  0xdc   : > { %825 = vst [vmem:[%s1367_s25 + $0x200] sm:$0xff] %v1037_v44  ;;  %826 = vst [vmem:[%s1367_s25 + $0x208] sm:$0xff] %v1038_v45  ;;  %v292_v46 = vpop.permute.xlu1 %291  ;;  %v289_v47 = vpop.permute.xlu0 %288 }
  0xdd   : > { %vm447_vm4 = vcmp.ge.s32.totalorder %v1349_v0, %v292_v46  ;;  %vm448_vm5 = vcmp.ge.s32.totalorder %v1355_v3, %v292_v46  ;;  %vm445_vm6 = vcmp.ge.s32.totalorder %v1349_v0, %v289_v47  ;;  %vm446_vm7 = vcmp.ge.s32.totalorder %v1355_v3, %v289_v47 }
  0xde   : > { %v1043_v48 = vsel %vm447_vm4, 1.0, %v1219_v6  ;;  %v1044_v49 = vsel %vm448_vm5, 1.0, %v1219_v6  ;;  %v1041_v50 = vsel %vm445_vm6, 1.0, %v1219_v6  ;;  %v1042_v51 = vsel %vm446_vm7, 1.0, %v1219_v6 }
  0xdf   : > { %831 = vst [vmem:[%s1367_s25 + $0x230] sm:$0xff] %v1043_v48  ;;  %832 = vst [vmem:[%s1367_s25 + $0x238] sm:$0xff] %v1044_v49 }
  0xe0   : > { %829 = vst [vmem:[%s1367_s25 + $0x220] sm:$0xff] %v1041_v50  ;;  %830 = vst [vmem:[%s1367_s25 + $0x228] sm:$0xff] %v1042_v51  ;;  %v298_v52 = vpop.permute.xlu1 %297  ;;  %v295_v53 = vpop.permute.xlu0 %294 }
  0xe1   : > { %vm451_vm8 = vcmp.ge.s32.totalorder %v1349_v0, %v298_v52  ;;  %vm452_vm9 = vcmp.ge.s32.totalorder %v1355_v3, %v298_v52  ;;  %vm449_vm10 = vcmp.ge.s32.totalorder %v1349_v0, %v295_v53  ;;  %vm450_vm11 = vcmp.ge.s32.totalorder %v1355_v3, %v295_v53 }
  0xe2   : > { %v1047_v54 = vsel %vm451_vm8, 1.0, %v1219_v6  ;;  %v1048_v55 = vsel %vm452_vm9, 1.0, %v1219_v6  ;;  %v1045_v56 = vsel %vm449_vm10, 1.0, %v1219_v6  ;;  %v1046_v57 = vsel %vm450_vm11, 1.0, %v1219_v6 }
  0xe3   : > { %835 = vst [vmem:[%s1367_s25 + $0x250] sm:$0xff] %v1047_v54  ;;  %836 = vst [vmem:[%s1367_s25 + $0x258] sm:$0xff] %v1048_v55 }
  0xe4   : > { %833 = vst [vmem:[%s1367_s25 + $0x240] sm:$0xff] %v1045_v56  ;;  %834 = vst [vmem:[%s1367_s25 + $0x248] sm:$0xff] %v1046_v57  ;;  %v304_v58 = vpop.permute.xlu1 %303  ;;  %v301_v59 = vpop.permute.xlu0 %300 }
  0xe5   : > { %vm455_vm12 = vcmp.ge.s32.totalorder %v1349_v0, %v304_v58  ;;  %vm456_vm13 = vcmp.ge.s32.totalorder %v1355_v3, %v304_v58  ;;  %vm453_vm14 = vcmp.ge.s32.totalorder %v1349_v0, %v301_v59  ;;  %vm454_vm15 = vcmp.ge.s32.totalorder %v1355_v3, %v301_v59 }
  0xe6   : > { %v1051_v60 = vsel %vm455_vm12, 1.0, %v1219_v6  ;;  %v1052_v61 = vsel %vm456_vm13, 1.0, %v1219_v6  ;;  %v1049_v62 = vsel %vm453_vm14, 1.0, %v1219_v6  ;;  %v1050_v63 = vsel %vm454_vm15, 1.0, %v1219_v6 }
  0xe7   : > { %839 = vst [vmem:[%s1367_s25 + $0x270] sm:$0xff] %v1051_v60  ;;  %840 = vst [vmem:[%s1367_s25 + $0x278] sm:$0xff] %v1052_v61 }
  0xe8   : > { %837 = vst [vmem:[%s1367_s25 + $0x260] sm:$0xff] %v1049_v62  ;;  %838 = vst [vmem:[%s1367_s25 + $0x268] sm:$0xff] %v1050_v63  ;;  %v310_v1 = vpop.permute.xlu1 %309  ;;  %v307_v2 = vpop.permute.xlu0 %306 }
  0xe9   : > { %vm459_vm0 = vcmp.ge.s32.totalorder %v1349_v0, %v310_v1  ;;  %vm460_vm1 = vcmp.ge.s32.totalorder %v1355_v3, %v310_v1  ;;  %vm457_vm2 = vcmp.ge.s32.totalorder %v1349_v0, %v307_v2  ;;  %vm458_vm3 = vcmp.ge.s32.totalorder %v1355_v3, %v307_v2 }
  0xea   : > { %v1055_v4 = vsel %vm459_vm0, 1.0, %v1219_v6  ;;  %v1056_v5 = vsel %vm460_vm1, 1.0, %v1219_v6  ;;  %v1053_v7 = vsel %vm457_vm2, 1.0, %v1219_v6  ;;  %v1054_v8 = vsel %vm458_vm3, 1.0, %v1219_v6 }
  0xeb   : > { %843 = vst [vmem:[%s1367_s25 + $0x290] sm:$0xff] %v1055_v4  ;;  %844 = vst [vmem:[%s1367_s25 + $0x298] sm:$0xff] %v1056_v5 }
  0xec   : > { %841 = vst [vmem:[%s1367_s25 + $0x280] sm:$0xff] %v1053_v7  ;;  %842 = vst [vmem:[%s1367_s25 + $0x288] sm:$0xff] %v1054_v8  ;;  %v316_v9 = vpop.permute.xlu1 %315  ;;  %v313_v10 = vpop.permute.xlu0 %312 }
  0xed   : > { %vm463_vm4 = vcmp.ge.s32.totalorder %v1349_v0, %v316_v9  ;;  %vm464_vm5 = vcmp.ge.s32.totalorder %v1355_v3, %v316_v9  ;;  %vm461_vm6 = vcmp.ge.s32.totalorder %v1349_v0, %v313_v10  ;;  %vm462_vm7 = vcmp.ge.s32.totalorder %v1355_v3, %v313_v10 }
  0xee   : > { %v1059_v11 = vsel %vm463_vm4, 1.0, %v1219_v6  ;;  %v1060_v12 = vsel %vm464_vm5, 1.0, %v1219_v6  ;;  %v1057_v13 = vsel %vm461_vm6, 1.0, %v1219_v6  ;;  %v1058_v14 = vsel %vm462_vm7, 1.0, %v1219_v6 }
  0xef   : > { %847 = vst [vmem:[%s1367_s25 + $0x2b0] sm:$0xff] %v1059_v11  ;;  %848 = vst [vmem:[%s1367_s25 + $0x2b8] sm:$0xff] %v1060_v12 }
  0xf0   : > { %845 = vst [vmem:[%s1367_s25 + $0x2a0] sm:$0xff] %v1057_v13  ;;  %846 = vst [vmem:[%s1367_s25 + $0x2a8] sm:$0xff] %v1058_v14  ;;  %v322_v15 = vpop.permute.xlu1 %321  ;;  %v319_v16 = vpop.permute.xlu0 %318 }
  0xf1   : > { %vm467_vm8 = vcmp.ge.s32.totalorder %v1349_v0, %v322_v15  ;;  %vm468_vm9 = vcmp.ge.s32.totalorder %v1355_v3, %v322_v15  ;;  %vm465_vm10 = vcmp.ge.s32.totalorder %v1349_v0, %v319_v16  ;;  %vm466_vm11 = vcmp.ge.s32.totalorder %v1355_v3, %v319_v16 }
  0xf2   : > { %v1063_v17 = vsel %vm467_vm8, 1.0, %v1219_v6  ;;  %v1064_v18 = vsel %vm468_vm9, 1.0, %v1219_v6  ;;  %v1061_v19 = vsel %vm465_vm10, 1.0, %v1219_v6  ;;  %v1062_v20 = vsel %vm466_vm11, 1.0, %v1219_v6 }
  0xf3   : > { %851 = vst [vmem:[%s1367_s25 + $0x2d0] sm:$0xff] %v1063_v17  ;;  %852 = vst [vmem:[%s1367_s25 + $0x2d8] sm:$0xff] %v1064_v18 }
  0xf4   : > { %849 = vst [vmem:[%s1367_s25 + $0x2c0] sm:$0xff] %v1061_v19  ;;  %850 = vst [vmem:[%s1367_s25 + $0x2c8] sm:$0xff] %v1062_v20  ;;  %v328_v21 = vpop.permute.xlu1 %327  ;;  %v325_v22 = vpop.permute.xlu0 %324 }
  0xf5   : > { %vm471_vm12 = vcmp.ge.s32.totalorder %v1349_v0, %v328_v21  ;;  %vm472_vm13 = vcmp.ge.s32.totalorder %v1355_v3, %v328_v21  ;;  %vm469_vm14 = vcmp.ge.s32.totalorder %v1349_v0, %v325_v22  ;;  %vm470_vm15 = vcmp.ge.s32.totalorder %v1355_v3, %v325_v22 }
  0xf6   : > { %v1067_v23 = vsel %vm471_vm12, 1.0, %v1219_v6  ;;  %v1068_v24 = vsel %vm472_vm13, 1.0, %v1219_v6  ;;  %v1065_v25 = vsel %vm469_vm14, 1.0, %v1219_v6  ;;  %v1066_v26 = vsel %vm470_vm15, 1.0, %v1219_v6 }
  0xf7   : > { %855 = vst [vmem:[%s1367_s25 + $0x2f0] sm:$0xff] %v1067_v23  ;;  %856 = vst [vmem:[%s1367_s25 + $0x2f8] sm:$0xff] %v1068_v24 }
  0xf8   : > { %853 = vst [vmem:[%s1367_s25 + $0x2e0] sm:$0xff] %v1065_v25  ;;  %854 = vst [vmem:[%s1367_s25 + $0x2e8] sm:$0xff] %v1066_v26  ;;  %v334_v27 = vpop.permute.xlu1 %333  ;;  %v331_v28 = vpop.permute.xlu0 %330 }
  0xf9   : > { %vm475_vm0 = vcmp.ge.s32.totalorder %v1349_v0, %v334_v27  ;;  %vm476_vm1 = vcmp.ge.s32.totalorder %v1355_v3, %v334_v27  ;;  %vm473_vm2 = vcmp.ge.s32.totalorder %v1349_v0, %v331_v28  ;;  %vm474_vm3 = vcmp.ge.s32.totalorder %v1355_v3, %v331_v28 }
  0xfa   : > { %v1071_v29 = vsel %vm475_vm0, 1.0, %v1219_v6  ;;  %v1072_v30 = vsel %vm476_vm1, 1.0, %v1219_v6  ;;  %v1069_v31 = vsel %vm473_vm2, 1.0, %v1219_v6  ;;  %v1070_v32 = vsel %vm474_vm3, 1.0, %v1219_v6 }
  0xfb   : > { %859 = vst [vmem:[%s1367_s25 + $0x310] sm:$0xff] %v1071_v29  ;;  %860 = vst [vmem:[%s1367_s25 + $0x318] sm:$0xff] %v1072_v30 }
  0xfc   : > { %857 = vst [vmem:[%s1367_s25 + $0x300] sm:$0xff] %v1069_v31  ;;  %858 = vst [vmem:[%s1367_s25 + $0x308] sm:$0xff] %v1070_v32  ;;  %v340_v33 = vpop.permute.xlu1 %339  ;;  %v337_v34 = vpop.permute.xlu0 %336 }
  0xfd   : > { %vm479_vm4 = vcmp.ge.s32.totalorder %v1349_v0, %v340_v33  ;;  %vm480_vm5 = vcmp.ge.s32.totalorder %v1355_v3, %v340_v33  ;;  %vm477_vm6 = vcmp.ge.s32.totalorder %v1349_v0, %v337_v34  ;;  %vm478_vm7 = vcmp.ge.s32.totalorder %v1355_v3, %v337_v34 }
  0xfe   : > { %v1075_v35 = vsel %vm479_vm4, 1.0, %v1219_v6  ;;  %v1076_v36 = vsel %vm480_vm5, 1.0, %v1219_v6  ;;  %v1073_v37 = vsel %vm477_vm6, 1.0, %v1219_v6  ;;  %v1074_v38 = vsel %vm478_vm7, 1.0, %v1219_v6 }
  0xff   : > { %863 = vst [vmem:[%s1367_s25 + $0x330] sm:$0xff] %v1075_v35  ;;  %864 = vst [vmem:[%s1367_s25 + $0x338] sm:$0xff] %v1076_v36 }
 0x100   : > { %861 = vst [vmem:[%s1367_s25 + $0x320] sm:$0xff] %v1073_v37  ;;  %862 = vst [vmem:[%s1367_s25 + $0x328] sm:$0xff] %v1074_v38  ;;  %v346_v39 = vpop.permute.xlu1 %345  ;;  %v343_v40 = vpop.permute.xlu0 %342 }
 0x101   : > { %vm483_vm8 = vcmp.ge.s32.totalorder %v1349_v0, %v346_v39  ;;  %vm484_vm9 = vcmp.ge.s32.totalorder %v1355_v3, %v346_v39  ;;  %vm481_vm10 = vcmp.ge.s32.totalorder %v1349_v0, %v343_v40  ;;  %vm482_vm11 = vcmp.ge.s32.totalorder %v1355_v3, %v343_v40 }
 0x102   : > { %v1079_v41 = vsel %vm483_vm8, 1.0, %v1219_v6  ;;  %v1080_v42 = vsel %vm484_vm9, 1.0, %v1219_v6  ;;  %v1077_v43 = vsel %vm481_vm10, 1.0, %v1219_v6  ;;  %v1078_v44 = vsel %vm482_vm11, 1.0, %v1219_v6 }
 0x103   : > { %867 = vst [vmem:[%s1367_s25 + $0x350] sm:$0xff] %v1079_v41  ;;  %868 = vst [vmem:[%s1367_s25 + $0x358] sm:$0xff] %v1080_v42 }
 0x104   : > { %865 = vst [vmem:[%s1367_s25 + $0x340] sm:$0xff] %v1077_v43  ;;  %866 = vst [vmem:[%s1367_s25 + $0x348] sm:$0xff] %v1078_v44  ;;  %v352_v45 = vpop.permute.xlu1 %351  ;;  %v349_v46 = vpop.permute.xlu0 %348 }
 0x105   : > { %vm487_vm12 = vcmp.ge.s32.totalorder %v1349_v0, %v352_v45  ;;  %vm488_vm13 = vcmp.ge.s32.totalorder %v1355_v3, %v352_v45  ;;  %vm485_vm14 = vcmp.ge.s32.totalorder %v1349_v0, %v349_v46  ;;  %vm486_vm15 = vcmp.ge.s32.totalorder %v1355_v3, %v349_v46 }
 0x106   : > { %v1083_v47 = vsel %vm487_vm12, 1.0, %v1219_v6  ;;  %v1084_v48 = vsel %vm488_vm13, 1.0, %v1219_v6  ;;  %v1081_v49 = vsel %vm485_vm14, 1.0, %v1219_v6  ;;  %v1082_v50 = vsel %vm486_vm15, 1.0, %v1219_v6 }
 0x107   : > { %871 = vst [vmem:[%s1367_s25 + $0x370] sm:$0xff] %v1083_v47  ;;  %872 = vst [vmem:[%s1367_s25 + $0x378] sm:$0xff] %v1084_v48 }
 0x108   : > { %869 = vst [vmem:[%s1367_s25 + $0x360] sm:$0xff] %v1081_v49  ;;  %870 = vst [vmem:[%s1367_s25 + $0x368] sm:$0xff] %v1082_v50  ;;  %v358_v51 = vpop.permute.xlu1 %357  ;;  %v355_v52 = vpop.permute.xlu0 %354 }
 0x109   : > { %vm491_vm0 = vcmp.ge.s32.totalorder %v1349_v0, %v358_v51  ;;  %vm492_vm1 = vcmp.ge.s32.totalorder %v1355_v3, %v358_v51  ;;  %vm489_vm2 = vcmp.ge.s32.totalorder %v1349_v0, %v355_v52  ;;  %vm490_vm3 = vcmp.ge.s32.totalorder %v1355_v3, %v355_v52 }
 0x10a   : > { %v1087_v53 = vsel %vm491_vm0, 1.0, %v1219_v6  ;;  %v1088_v54 = vsel %vm492_vm1, 1.0, %v1219_v6  ;;  %v1085_v55 = vsel %vm489_vm2, 1.0, %v1219_v6  ;;  %v1086_v56 = vsel %vm490_vm3, 1.0, %v1219_v6 }
 0x10b   : > { %875 = vst [vmem:[%s1367_s25 + $0x390] sm:$0xff] %v1087_v53  ;;  %876 = vst [vmem:[%s1367_s25 + $0x398] sm:$0xff] %v1088_v54 }
 0x10c   : > { %873 = vst [vmem:[%s1367_s25 + $0x380] sm:$0xff] %v1085_v55  ;;  %874 = vst [vmem:[%s1367_s25 + $0x388] sm:$0xff] %v1086_v56  ;;  %v364_v57 = vpop.permute.xlu1 %363  ;;  %v361_v58 = vpop.permute.xlu0 %360 }
 0x10d   : > { %vm495_vm4 = vcmp.ge.s32.totalorder %v1349_v0, %v364_v57  ;;  %vm496_vm5 = vcmp.ge.s32.totalorder %v1355_v3, %v364_v57  ;;  %vm493_vm6 = vcmp.ge.s32.totalorder %v1349_v0, %v361_v58  ;;  %vm494_vm7 = vcmp.ge.s32.totalorder %v1355_v3, %v361_v58 }
 0x10e   : > { %v1091_v59 = vsel %vm495_vm4, 1.0, %v1219_v6  ;;  %v1092_v60 = vsel %vm496_vm5, 1.0, %v1219_v6  ;;  %v1089_v61 = vsel %vm493_vm6, 1.0, %v1219_v6  ;;  %v1090_v62 = vsel %vm494_vm7, 1.0, %v1219_v6 }
 0x10f   : > { %879 = vst [vmem:[%s1367_s25 + $0x3b0] sm:$0xff] %v1091_v59  ;;  %880 = vst [vmem:[%s1367_s25 + $0x3b8] sm:$0xff] %v1092_v60 }
 0x110   : > { %877 = vst [vmem:[%s1367_s25 + $0x3a0] sm:$0xff] %v1089_v61  ;;  %878 = vst [vmem:[%s1367_s25 + $0x3a8] sm:$0xff] %v1090_v62  ;;  %v370_v63 = vpop.permute.xlu1 %369  ;;  %v367_v1 = vpop.permute.xlu0 %366 }
 0x111   : > { %vm499_vm8 = vcmp.ge.s32.totalorder %v1349_v0, %v370_v63  ;;  %vm500_vm9 = vcmp.ge.s32.totalorder %v1355_v3, %v370_v63  ;;  %vm497_vm10 = vcmp.ge.s32.totalorder %v1349_v0, %v367_v1  ;;  %vm498_vm11 = vcmp.ge.s32.totalorder %v1355_v3, %v367_v1 }
 0x112   : > { %v1095_v2 = vsel %vm499_vm8, 1.0, %v1219_v6  ;;  %v1096_v4 = vsel %vm500_vm9, 1.0, %v1219_v6  ;;  %v1093_v5 = vsel %vm497_vm10, 1.0, %v1219_v6  ;;  %v1094_v7 = vsel %vm498_vm11, 1.0, %v1219_v6 }
 0x113   : > { %883 = vst [vmem:[%s1367_s25 + $0x3d0] sm:$0xff] %v1095_v2  ;;  %884 = vst [vmem:[%s1367_s25 + $0x3d8] sm:$0xff] %v1096_v4 }
 0x114   : > { %881 = vst [vmem:[%s1367_s25 + $0x3c0] sm:$0xff] %v1093_v5  ;;  %882 = vst [vmem:[%s1367_s25 + $0x3c8] sm:$0xff] %v1094_v7  ;;  %v376_v8 = vpop.permute.xlu1 %375  ;;  %v373_v9 = vpop.permute.xlu0 %372 }
 0x115   : > { %vm503_vm12 = vcmp.ge.s32.totalorder %v1349_v0, %v376_v8  ;;  %vm504_vm13 = vcmp.ge.s32.totalorder %v1355_v3, %v376_v8  ;;  %vm501_vm14 = vcmp.ge.s32.totalorder %v1349_v0, %v373_v9  ;;  %vm502_vm15 = vcmp.ge.s32.totalorder %v1355_v3, %v373_v9 }
 0x116   : > { %v1099_v10 = vsel %vm503_vm12, 1.0, %v1219_v6  ;;  %v1100_v11 = vsel %vm504_vm13, 1.0, %v1219_v6  ;;  %v1097_v12 = vsel %vm501_vm14, 1.0, %v1219_v6  ;;  %v1098_v13 = vsel %vm502_vm15, 1.0, %v1219_v6 }
 0x117   : > { %887 = vst [vmem:[%s1367_s25 + $0x3f0] sm:$0xff] %v1099_v10  ;;  %888 = vst [vmem:[%s1367_s25 + $0x3f8] sm:$0xff] %v1100_v11 }
 0x118   : > { %885 = vst [vmem:[%s1367_s25 + $0x3e0] sm:$0xff] %v1097_v12  ;;  %886 = vst [vmem:[%s1367_s25 + $0x3e8] sm:$0xff] %v1098_v13 }
 0x119   : > { %1167 = shalt.err (!%p1164_p3)
}
 0x11a   : > { %s1168_s11 = scalar_lea.hbm %s1738_s30, 16384  ;;  %s1172_s18 = scalar_lea.hbm %s1798_s1, 32768 }
 0x11b   : > { %p1169_p4 = scmp.ne.s32.totalorder %s1738_s30, %s1168_s11  ;;  %p1173_p9 = scmp.lt.u32.totalorder %s1738_s30, %s1798_s1 }
 0x11c   : > { %p1174_p10 = scmp.lt.u32.totalorder %s1172_s18, %s1168_s11  ;;  %p1176_p12 = scmp.lt.u32.totalorder %s1168_s11, %s1738_s30 }
 0x11d   : > { %p1170_p7 = pnand %p1169_p4, %p1271_p5 }
 0x11e   : > { %p1175_p11 = por %p1174_p10, %p1173_p9 }
 0x11f   : > { %p1171_p8 = pneg %p1170_p7 }
 0x120   : > { %p1177_p13 = por %p1176_p12, %p1175_p11 }
 0x122   : > { %p1178_p0 = pnand %p1177_p13, %p1171_p8 }
 0x124   : > { %1181 = shalt.err (!%p1178_p0)
}
 0x125   : > { %s1221_s21 = smov 256   ;;  %s1222_s22 = smov 16  }
 0x126   : > { %1109 = dma.vmem_to_hbm [thread:$0]  (%p1271_p5), %s1740_s27, 16384, %s1738_s30, %s1756_s2, %s1221_s21, %s1221_s21, %s1222_s22  }
 0x127 PF: > { %p1115_p1 = scmp.ge.s32.totalorder %s1216_s9, 2  ;;  %s919_s23 = sand.u32 1, %s1204_s6  }
 0x128   : > { %s920_s24 = scalar_lea.sflag [#allocation3], %s919_s23 }
 0x129   : > { %p1112_p2 = pnand %p1115_p1, %p1275_p6 }
 0x12b   : > { %1199 = dma.done.wait (!%p1112_p2), %s920_s24, 16384  }
 0x12c   : > { %1201 = vsyncadd (!%p1112_p2), %s920_s24, 4294950912  ;;  %p11_p3 = scmp.ge.s32.totalorder %s1258_s12, 4   ;;  %s1801_s6 = smov %s1208_s7 }
 0x12d   : > { %s1802_s7 = smov %s1212_s8  ;;  %s1803_s8 = smov %s1269_s15 }
 0x12e   : > { %s1804_s9 = smov %s1258_s12  ;;  %13 = sbr.rel (!%p11_p3) target bundleno = 3 (0x3), region = 59 }
 0x135   :  { %925 = vsyncpa [#allocation3], 1 }
 0x136   :  { %927 = vsyncpa [#allocation3 + $0x1], 1 }

</bundles_post_ra>
